<compile_context>
chip_gen: v7x
topology: tpu7x:2x2x1
jax: 0.10.0
libtpu: 0.0.40
codegen_flags: <defaults>
</compile_context>

<pallas_src>
import jax
import jax.numpy as jnp
from jax.experimental import pallas as pl
from jax.experimental.pallas import tpu as pltpu

EPS = 1e-6


def _rms_norm_f32(x, w):
    var = jnp.mean(x * x, axis=-1, keepdims=True)
    return x * jax.lax.rsqrt(var + EPS) * w


# ---------------------------------------------------------------------------
# Kernel 1: fused T5LayerNorm(x) @ [wq | wk | wv]
# grid = (S // TS, 3*inner // TN); column axis innermost ("arbitrary" so the
# cached normed tile in scratch is valid for every column step of a seq tile).
# ---------------------------------------------------------------------------
def qkv_kernel(x_ref, ln_ref, w_ref, o_ref, n_sc):
    @pl.when(pl.program_id(1) == 0)
    def _():
        x = x_ref[...].astype(jnp.float32)
        n_sc[...] = _rms_norm_f32(x, ln_ref[...].astype(jnp.float32)).astype(n_sc.dtype)

    o_ref[...] = jnp.dot(n_sc[...], w_ref[...],
                         preferred_element_type=jnp.float32).astype(o_ref.dtype)


# ---------------------------------------------------------------------------
# Kernel 2: flash-style attention with streamed relative-position bias.
# grid = (H, S // TQ, S // TK); kv axis innermost ("arbitrary").
# ---------------------------------------------------------------------------
def flash_attn_kernel(q_ref, k_ref, v_ref, b_ref, o_ref, m_sc, l_sc, acc_sc):
    kv = pl.program_id(2)

    @pl.when(kv == 0)
    def _():
        m_sc[...] = jnp.full_like(m_sc, -jnp.inf)
        l_sc[...] = jnp.zeros_like(l_sc)
        acc_sc[...] = jnp.zeros_like(acc_sc)

    q = q_ref[0]                                             # (TQ, DK) bf16
    k = k_ref[0]                                             # (TK, DK) bf16
    s = jax.lax.dot_general(q, k, (((1,), (1,)), ((), ())),
                            preferred_element_type=jnp.float32)   # (TQ, TK)
    s = s + b_ref[0].astype(jnp.float32)                     # T5: no 1/sqrt(d_kv) scaling

    m_prev = m_sc[...]
    m_new = jnp.maximum(m_prev, jnp.max(s, axis=-1, keepdims=True))
    alpha = jnp.exp(m_prev - m_new)
    p = jnp.exp(s - m_new)
    l_sc[...] = alpha * l_sc[...] + jnp.sum(p, axis=-1, keepdims=True)
    acc_sc[...] = alpha * acc_sc[...] + jnp.dot(p.astype(v_ref.dtype), v_ref[0],
                                                preferred_element_type=jnp.float32)
    m_sc[...] = m_new

    @pl.when(kv == pl.num_programs(2) - 1)
    def _():
        inv_l = pl.reciprocal(l_sc[...], approx=True)        # EUP slot, frees the VALU
        o_ref[0] = (acc_sc[...] * inv_l).astype(o_ref.dtype)


# ---------------------------------------------------------------------------
# Kernel 3: attention output projection + residual.
# grid = (S // TS, inner // TKO); K-reduction axis innermost ("arbitrary").
# ---------------------------------------------------------------------------
def out_proj_kernel(ctx_ref, w_ref, x_ref, o_ref, acc_sc):
    k = pl.program_id(1)

    @pl.when(k == 0)
    def _():
        acc_sc[...] = jnp.zeros_like(acc_sc)

    acc_sc[...] += jnp.dot(ctx_ref[...], w_ref[...],
                           preferred_element_type=jnp.float32)

    @pl.when(k == pl.num_programs(1) - 1)
    def _():
        o_ref[...] = (x_ref[...].astype(jnp.float32) + acc_sc[...]).astype(o_ref.dtype)


# ---------------------------------------------------------------------------
# Kernel 4: fused T5LayerFF (RMSNorm + gated GELU + down-proj + residual).
# grid = (S // TS, F // TF); d_ff reduction axis innermost ("arbitrary").
# ---------------------------------------------------------------------------
def ff_kernel(h1_ref, ln_ref, wi0_ref, wi1_ref, wo_ref, o_ref, n_sc, acc_sc):
    f = pl.program_id(1)

    @pl.when(f == 0)
    def _():
        h = h1_ref[...].astype(jnp.float32)
        n_sc[...] = _rms_norm_f32(h, ln_ref[...].astype(jnp.float32)).astype(n_sc.dtype)
        acc_sc[...] = jnp.zeros_like(acc_sc)

    n2 = n_sc[...]                                            # (TS, D) bf16
    g = jax.nn.gelu(jnp.dot(n2, wi0_ref[...], preferred_element_type=jnp.float32),
                    approximate=True)                         # NewGELU (tanh approx)
    u = jnp.dot(n2, wi1_ref[...], preferred_element_type=jnp.float32)
    acc_sc[...] += jnp.dot((g * u).astype(wo_ref.dtype), wo_ref[...],
                           preferred_element_type=jnp.float32)

    @pl.when(f == pl.num_programs(1) - 1)
    def _():
        o_ref[...] = (h1_ref[...].astype(jnp.float32) + acc_sc[...]).astype(o_ref.dtype)


def _tile(dim, pref):
    t = min(pref, dim)
    assert dim % t == 0, f"dimension {dim} not divisible by tile {t}"
    return t


def t5_block_next(hidden_states, position_bias, params, *, vmem_limit=48 * 1024 * 1024):
    """hidden_states: (1, S, D); position_bias: (1, H, S, S)."""
    B, S, D = hidden_states.shape
    assert B == 1, "kernel handles a single batch element (as in the reference script)"
    H = position_bias.shape[1]
    inner = params["wq"].shape[1]          # = H * d_kv
    DK = inner // H
    F = params["wi0"].shape[1]

    x = hidden_states[0].astype(jnp.float32)                 # (S, D) f32 activations
    bias = position_bias[0].astype(jnp.bfloat16)             # (H, S, S) bf16 (streamed)

    bf16 = lambda a: a.astype(jnp.bfloat16)
    ln1 = params["ln1"].reshape(1, D).astype(jnp.float32)
    ln2 = params["ln2"].reshape(1, D).astype(jnp.float32)
    wqkv = jnp.concatenate([bf16(params["wq"]), bf16(params["wk"]), bf16(params["wv"])],
                           axis=1)                            # (D, 3*inner) fused projection
    wo = bf16(params["wo"])                                   # (inner, D)
    wi0, wi1 = bf16(params["wi0"]), bf16(params["wi1"])       # (D, F)
    wo_ff = bf16(params["wo_ff"])                             # (F, D)

    TS = _tile(S, 128)            # sequence tile (128-aligned for v5e MXU / lane-dense vst)
    TN = _tile(3 * inner, 256)    # QKV output-column tile
    TQ = _tile(S, 128)            # flash query tile
    TK = _tile(S, 128)            # flash kv tile
    TKO = _tile(inner, 512)       # Wo K-reduction tile
    TF = _tile(F, 256)            # d_ff reduction tile

    cp = lambda sem: pltpu.CompilerParams(dimension_semantics=sem,
                                          vmem_limit_bytes=vmem_limit)

    # ---- 1) fused RMSNorm + QKV projection -> (S, 3*inner) bf16 -------------
    qkv = pl.pallas_call(
        qkv_kernel,
        out_shape=jax.ShapeDtypeStruct((S, 3 * inner), jnp.bfloat16),
        grid_spec=pltpu.PrefetchScalarGridSpec(
            num_scalar_prefetch=0,
            grid=(S // TS, (3 * inner) // TN),
            in_specs=[
                pl.BlockSpec((TS, D), lambda s, n: (s, 0)),
                pl.BlockSpec((1, D), lambda s, n: (0, 0)),
                pl.BlockSpec((D, TN), lambda s, n: (0, n)),
            ],
            out_specs=pl.BlockSpec((TS, TN), lambda s, n: (s, n)),
            scratch_shapes=[pltpu.VMEM((TS, D), jnp.bfloat16)],
        ),
        compiler_params=cp(("parallel", "arbitrary")),
    )(x, ln1, wqkv)

    # head-major (H, S, DK) layout for the attention kernel (layout plumbing in XLA).
    q = qkv[:, 0 * inner:1 * inner].reshape(S, H, DK).transpose(1, 0, 2)
    k = qkv[:, 1 * inner:2 * inner].reshape(S, H, DK).transpose(1, 0, 2)
    v = qkv[:, 2 * inner:3 * inner].reshape(S, H, DK).transpose(1, 0, 2)

    # ---- 2) flash attention with streamed position bias -> (H, S, DK) bf16 --
    ctx = pl.pallas_call(
        flash_attn_kernel,
        out_shape=jax.ShapeDtypeStruct((H, S, DK), jnp.bfloat16),
        grid_spec=pltpu.PrefetchScalarGridSpec(
            num_scalar_prefetch=0,
            grid=(H, S // TQ, S // TK),
            in_specs=[
                pl.BlockSpec((1, TQ, DK), lambda h, qi, ki: (h, qi, 0)),
                pl.BlockSpec((1, TK, DK), lambda h, qi, ki: (h, ki, 0)),
                pl.BlockSpec((1, TK, DK), lambda h, qi, ki: (h, ki, 0)),
                pl.BlockSpec((1, TQ, TK), lambda h, qi, ki: (h, qi, ki)),
            ],
            out_specs=pl.BlockSpec((1, TQ, DK), lambda h, qi, ki: (h, qi, 0)),
            scratch_shapes=[
                pltpu.VMEM((TQ, 1), jnp.float32),   # running max
                pltpu.VMEM((TQ, 1), jnp.float32),   # running denom
                pltpu.VMEM((TQ, DK), jnp.float32),  # output accumulator
            ],
        ),
        compiler_params=cp(("parallel", "parallel", "arbitrary")),
    )(q, k, v, bias)

    ctx = ctx.transpose(1, 0, 2).reshape(S, inner)            # (S, H*DK) bf16

    # ---- 3) Wo projection + residual -> h1 (S, D) f32 ------------------------
    h1 = pl.pallas_call(
        out_proj_kernel,
        out_shape=jax.ShapeDtypeStruct((S, D), jnp.float32),
        grid_spec=pltpu.PrefetchScalarGridSpec(
            num_scalar_prefetch=0,
            grid=(S // TS, inner // TKO),
            in_specs=[
                pl.BlockSpec((TS, TKO), lambda s, k: (s, k)),
                pl.BlockSpec((TKO, D), lambda s, k: (k, 0)),
                pl.BlockSpec((TS, D), lambda s, k: (s, 0)),
            ],
            out_specs=pl.BlockSpec((TS, D), lambda s, k: (s, 0)),
            scratch_shapes=[pltpu.VMEM((TS, D), jnp.float32)],
        ),
        compiler_params=cp(("parallel", "arbitrary")),
    )(ctx, wo, x)

    # ---- 4) fused T5LayerFF -> out (S, D) -------------------------------------
    out = pl.pallas_call(
        ff_kernel,
        out_shape=jax.ShapeDtypeStruct((S, D), hidden_states.dtype),
        grid_spec=pltpu.PrefetchScalarGridSpec(
            num_scalar_prefetch=0,
            grid=(S // TS, F // TF),
            in_specs=[
                pl.BlockSpec((TS, D), lambda s, f: (s, 0)),
                pl.BlockSpec((1, D), lambda s, f: (0, 0)),
                pl.BlockSpec((D, TF), lambda s, f: (0, f)),
                pl.BlockSpec((D, TF), lambda s, f: (0, f)),
                pl.BlockSpec((TF, D), lambda s, f: (f, 0)),
            ],
            out_specs=pl.BlockSpec((TS, D), lambda s, f: (s, 0)),
            scratch_shapes=[pltpu.VMEM((TS, D), jnp.bfloat16),
                            pltpu.VMEM((TS, D), jnp.float32)],
        ),
        compiler_params=cp(("parallel", "arbitrary")),
    )(h1, ln2, wi0, wi1, wo_ff)

    return out[None]                                          # (1, S, D)


def t5_block_ref(hidden_states, position_bias, params):
    """Pure-JAX f32 reference; matmul operands quantized to bf16 exactly where the
    mixed-precision kernel does, so the comparison isolates kernel-structure errors."""
    bq = lambda a: a.astype(jnp.bfloat16).astype(jnp.float32)

    x = hidden_states[0].astype(jnp.float32)
    S, D = x.shape
    bias = bq(position_bias[0])
    H = bias.shape[0]
    inner = params["wq"].shape[1]
    DK = inner // H

    def rms(v, w):
        return v * jax.lax.rsqrt(jnp.mean(v * v, -1, keepdims=True) + EPS) * w

    ln1 = params["ln1"].reshape(1, D).astype(jnp.float32)
    ln2 = params["ln2"].reshape(1, D).astype(jnp.float32)

    n1 = bq(rms(x, ln1))
    qh = bq(n1 @ bq(params["wq"])).reshape(S, H, DK).transpose(1, 0, 2)
    kh = bq(n1 @ bq(params["wk"])).reshape(S, H, DK).transpose(1, 0, 2)
    vh = bq(n1 @ bq(params["wv"])).reshape(S, H, DK).transpose(1, 0, 2)
    scores = jnp.einsum("hqd,hkd->hqk", qh, kh) + bias        # no 1/sqrt(d_kv) in T5
    p = bq(jax.nn.softmax(scores, axis=-1))
    ctx = bq(jnp.einsum("hqk,hkd->hqd", p, vh).transpose(1, 0, 2).reshape(S, inner))
    h1 = x + ctx @ bq(params["wo"])

    n2 = bq(rms(h1, ln2))
    g = jax.nn.gelu(n2 @ bq(params["wi0"]), approximate=True)
    u = n2 @ bq(params["wi1"])
    ff = bq(g * u) @ bq(params["wo_ff"])
    return (h1 + ff)[None].astype(hidden_states.dtype)


if __name__ == "__main__":
    # Small, tile-aligned stand-in for the T5-XXL block (real: S=512, D=4096, H=64,
    # d_kv=64, d_ff=10240).  Chosen >= (8,128) so no masked partial stores.
    B, S, D, H, DK, F = 1, 256, 256, 4, 64, 512

    key = jax.random.PRNGKey(0)
    ks = jax.random.split(key, 11)
    scale = 0.05
    params = {
        "ln1":   1.0 + 0.01 * jax.random.normal(ks[0], (1, D), jnp.float32),
        "wq":    scale * jax.random.normal(ks[1], (D, H * DK), jnp.float32),
        "wk":    scale * jax.random.normal(ks[2], (D, H * DK), jnp.float32),
        "wv":    scale * jax.random.normal(ks[3], (D, H * DK), jnp.float32),
        "wo":    scale * jax.random.normal(ks[4], (H * DK, D), jnp.float32),
        "ln2":   1.0 + 0.01 * jax.random.normal(ks[5], (1, D), jnp.float32),
        "wi0":   scale * jax.random.normal(ks[6], (D, F), jnp.float32),
        "wi1":   scale * jax.random.normal(ks[7], (D, F), jnp.float32),
        "wo_ff": scale * jax.random.normal(ks[8], (F, D), jnp.float32),
    }

    hidden_states = jax.random.normal(ks[9], (B, S, D), jnp.float32)            # "hidden_states"
    position_bias = 0.1 * jax.random.normal(ks[10], (B, H, S, S), jnp.float32)  # "temp_value"
    # TODO(synk): the zero attention mask `t` is ignored by HF T5Attention when a
    # precomputed position_bias is supplied, so it is intentionally not a kernel input.

    out = jax.block_until_ready(t5_block_next(hidden_states, position_bias, params))
    ref = t5_block_ref(hidden_states, position_bias, params)

    assert out.shape == (B, S, D)
    assert jnp.allclose(out, ref, rtol=1e-2, atol=1e-2), (
        "kernel/ref mismatch, max abs diff = %f" % float(jnp.max(jnp.abs(out - ref))))
    print("KERNEL_OK")
</pallas_src>

<mosaic_0001>
module attributes {stable_mosaic.version = 11 : i64} {
  func.func @qkv_kernel(%arg0: i32, %arg1: i32, %arg2: memref<128x256xf32, #tpu.memory_space<vmem>>, %arg3: memref<1x256xf32, #tpu.memory_space<vmem>>, %arg4: memref<256x256xbf16, #tpu.memory_space<vmem>>, %arg5: memref<128x256xbf16, #tpu.memory_space<vmem>>, %arg6: memref<128x256xbf16, #tpu.memory_space<vmem>>) attributes {dimension_semantics = [#tpu.dimension_semantics<parallel>, #tpu.dimension_semantics<arbitrary>], iteration_bounds = array<i64: 2, 3>, scalar_prefetch = 0 : i64, scratch_operands = 1 : i64, tpu.core_type = #tpu.core_type<tc>, window_params = [{transform_indices = @transform_0, window_bounds = array<i64: 128, 256>}, {pipeline_mode = #tpu.pipeline_mode<synchronous>, transform_indices = @transform_1, window_bounds = array<i64: 1, 256>}, {transform_indices = @transform_2, window_bounds = array<i64: 256, 256>}, {transform_indices = @transform_3, window_bounds = array<i64: 128, 256>}]} {
    %c0_i32 = arith.constant 0 : i32
    %0 = arith.cmpi eq, %arg1, %c0_i32 : i32
    %1 = arith.extui %0 : i1 to i32
    %c0_i32_0 = arith.constant 0 : i32
    %2 = arith.cmpi ne, %1, %c0_i32_0 : i32
    scf.if %2 {
      %c0_6 = arith.constant 0 : index
      %c0_7 = arith.constant 0 : index
      %8 = vector.load %arg2[%c0_6, %c0_7] : memref<128x256xf32, #tpu.memory_space<vmem>>, vector<128x256xf32>
      %c0_8 = arith.constant 0 : index
      %c0_9 = arith.constant 0 : index
      %9 = vector.load %arg3[%c0_8, %c0_9] : memref<1x256xf32, #tpu.memory_space<vmem>>, vector<1x256xf32>
      %10 = arith.mulf %8, %8 : vector<128x256xf32>
      %cst_10 = arith.constant dense<0.000000e+00> : vector<128xf32>
      %11 = vector.multi_reduction <add>, %10, %cst_10 [1] : vector<128x256xf32> to vector<128xf32>
      %12 = vector.shape_cast %11 : vector<128xf32> to vector<128x1xf32>
      %cst_11 = arith.constant 2.560000e+02 : f32
      %13 = vector.broadcast %cst_11 : f32 to vector<128x1xf32>
      %14 = arith.divf %12, %13 : vector<128x1xf32>
      %cst_12 = arith.constant 9.99999997E-7 : f32
      %15 = vector.broadcast %cst_12 : f32 to vector<128x1xf32>
      %16 = arith.addf %14, %15 : vector<128x1xf32>
      %17 = math.rsqrt %16 : vector<128x1xf32>
      %18 = vector.broadcast %17 : vector<128x1xf32> to vector<128x256xf32>
      %19 = arith.mulf %8, %18 : vector<128x256xf32>
      %20 = vector.broadcast %9 : vector<1x256xf32> to vector<128x256xf32>
      %21 = arith.mulf %19, %20 : vector<128x256xf32>
      %22 = arith.truncf %21 : vector<128x256xf32> to vector<128x256xbf16>
      %c0_13 = arith.constant 0 : index
      %c0_14 = arith.constant 0 : index
      %23 = vector.load %arg6[%c0_13, %c0_14] : memref<128x256xbf16, #tpu.memory_space<vmem>>, vector<128x256xbf16>
      tpu.vector_store %arg6[%c0_13, %c0_14], %22 {strides = array<i32>} : memref<128x256xbf16, #tpu.memory_space<vmem>>, vector<128x256xbf16>,
    } else {
    }
    %c0 = arith.constant 0 : index
    %c0_1 = arith.constant 0 : index
    %3 = vector.load %arg6[%c0, %c0_1] : memref<128x256xbf16, #tpu.memory_space<vmem>>, vector<128x256xbf16>
    %c0_2 = arith.constant 0 : index
    %c0_3 = arith.constant 0 : index
    %4 = vector.load %arg4[%c0_2, %c0_3] : memref<256x256xbf16, #tpu.memory_space<vmem>>, vector<256x256xbf16>
    %cst = arith.constant dense<0.000000e+00> : vector<128x256xf32>
    %5 = tpu.matmul %3, %4, %cst {dimension_numbers = #tpu.dot_dimension_numbers<[1], [0], [0], [1], [0, 0, 1, 1], [], []>} : vector<128x256xbf16>, vector<256x256xbf16>, vector<128x256xf32> -> vector<128x256xf32>
    %6 = arith.truncf %5 : vector<128x256xf32> to vector<128x256xbf16>
    %c0_4 = arith.constant 0 : index
    %c0_5 = arith.constant 0 : index
    %7 = vector.load %arg5[%c0_4, %c0_5] : memref<128x256xbf16, #tpu.memory_space<vmem>>, vector<128x256xbf16>
    tpu.vector_store %arg5[%c0_4, %c0_5], %6 {strides = array<i32>} : memref<128x256xbf16, #tpu.memory_space<vmem>>, vector<128x256xbf16>,
    return
  }
  func.func @transform_0(%arg0: i32, %arg1: i32) -> (i32, i32) {
    %c0_i32 = arith.constant 0 : i32
    %c0_i32_0 = arith.constant 0 : i32
    return %arg0, %c0_i32 : i32, i32
  }
  func.func @transform_1(%arg0: i32, %arg1: i32) -> (i32, i32) {
    %c0_i32 = arith.constant 0 : i32
    %c0_i32_0 = arith.constant 0 : i32
    %c0_i32_1 = arith.constant 0 : i32
    return %c0_i32, %c0_i32_0 : i32, i32
  }
  func.func @transform_2(%arg0: i32, %arg1: i32) -> (i32, i32) {
    %c0_i32 = arith.constant 0 : i32
    %c0_i32_0 = arith.constant 0 : i32
    return %c0_i32, %arg1 : i32, i32
  }
  func.func @transform_3(%arg0: i32, %arg1: i32) -> (i32, i32) {
    %c0_i32 = arith.constant 0 : i32
    return %arg0, %arg1 : i32, i32
  }
}

</mosaic_0001>

<bundles_post_ra>
// kernel: tpu_custom_call.1
= control target key start
LH: loop header
LB: loop body
LE: loop exit
PB: predicated region body
PF: predicated region fallthrough
CT: control target
= control target key end

     0   :  { %s2297_s0 = inlined_call_operand.hbm [shape: f32[256,256], index: 0, kind: input, shape index: {}]   ;;  %s2298_s1 = inlined_call_operand.vmem [shape: f32[1,256], index: 1, kind: input, shape index: {}]   ;;  %s2299_s2 = inlined_call_operand.hbm [shape: bf16[256,768], index: 2, kind: input, shape index: {}]   ;;  %s2300_s3 = inlined_call_operand.hbm [shape: bf16[256,768], index: 3, kind: output, shape index: {}]  }
   0x1   :  { %2312 = sst [smem:[#allocation18_spill]] %s2297_s0 }
   0x2   :  { %2313 = sst [smem:[#allocation19_spill]] %s2298_s1 }
   0x3   :  { %2314 = sst [smem:[#allocation20_spill]] %s2300_s3 }
   0x4   :  { %8 = vsyncpa [#allocation4], 0 }
   0x5   :  { %10 = vsyncpa [#allocation4 + $0x1], 0 }
   0x6   :  { %11 = vsyncpa [#allocation7], 0 }
   0x7   :  { %13 = vsyncpa [#allocation7 + $0x1], 0 }
   0x8   :  { %14 = vsyncpa [#allocation5], 0 }
   0x9   :  { %16 = vsyncpa [#allocation5 + $0x1], 0  ;;  %s1666_s12 = smov 0   ;;  %s1668_s13 = smov 0  }
   0xa   :  { %s1670_s14 = smov 0   ;;  %s1672_s15 = smov 0  }
   0xb   :  { %s1674_s16 = smov 0   ;;  %s1676_s17 = smov 0  }
   0xc   :  { %s1678_s18 = smov 0   ;;  %s1680_s19 = smov 0  }
   0xd   :  { %s1682_s20 = smov 0   ;;  %s1684_s21 = smov 0  }
   0xe   :  { %s1686_s22 = smov 0   ;;  %s1688_s23 = smov 0  }
   0xf   :  { %s1690_s24 = smov 0   ;;  %s1692_s25 = smov 0  }
  0x10 LB: > { %2315 = sst [smem:[#allocation12_spill]] %s1621_s22  ;;  %s1081_s26 = sadd.s32 4294967295, %s1633_s25   ;;  %s1633_s25 = sphi %s1692_s25, %s22_s25   ;;  %s1629_s24 = sphi %s1690_s24, %s2349_s24   ;;  %s1625_s23 = sphi %s1688_s23, %s2361_s23   ;;  %s1621_s22 = sphi %s1686_s22, %s2347_s22   ;;  %s1617_s21 = sphi %s1684_s21, %s2360_s21   ;;  %s1613_s20 = sphi %s1682_s20, %s2359_s20   ;;  %s1609_s19 = sphi %s1680_s19, %s2358_s19   ;;  %s1605_s18 = sphi %s1678_s18, %s2357_s18   ;;  %s1601_s17 = sphi %s1676_s17, %s2356_s17   ;;  %s1597_s16 = sphi %s1674_s16, %s2355_s16   ;;  %s1593_s15 = sphi %s1672_s15, %s2354_s15   ;;  %s1589_s14 = sphi %s1670_s14, %s2353_s14   ;;  %s1585_s13 = sphi %s1668_s13, %s2352_s13   ;;  %s1581_s12 = sphi %s1666_s12, %s2351_s12  }
  0x11   : > { %2316 = sst [smem:[#allocation13_spill]] %s1629_s24  ;;  %p48_p0 = scmp.ne.s32.totalorder %s1613_s20, %s1609_s19 }
  0x12   : > { %p2302_p1 = scmp.eq.s32.totalorder %s1633_s25, 0  ;;  %p54_p2 = scmp.ne.s32.totalorder %s1609_s19, %s1605_s18 }
  0x13   : > { %p1741_p3 = scmp.eq.s32.totalorder %s1081_s26, 0  ;;  %p1745_p4 = scmp.eq.s32.totalorder %s1081_s26, 5 }
  0x14   : > { %p50_p5 = por %p2302_p1, %p48_p0  ;;  %p2301_p7 = scmp.lt.s32.totalorder %s1633_s25, 6 }
  0x15   : > { %s2318_s30 = scalar_select %p1745_p4, 1, 0 }
  0x16   : > { %p1753_p6 = por %p1741_p3, %p54_p2  ;;  %s156_s5 = sand.u32 1, %s1613_s20  }
  0x17   : > { %s1153_s6 = sshll.u32 %s1629_s24, 12  ;;  %s1085_s7 = sshll.u32 %s156_s5, 8 }
  0x18   : > { %s2319_s4 = scalar_select %p1753_p6, 1, 0 }
  0x19   : > { %s2320_s0 = sld [smem:[#allocation18_spill]]  ;;  %s160_s11 = scalar_lea.vmem [#allocation3], %s1085_s7 }
  0x1a   : > { %s168_s18 = sshll.u32 %s160_s11, 4  ;;  %p1767_p8 = pnand %p2301_p7, %p50_p5  ;;  %s1771_s18 = int_to_ptr.vmem [resolvable:$true] %s168_s18 }
  0x1b   : > { %s1773_s28 = scalar_lea.sflag [#allocation4], %s156_s5 }
  0x1c   : > { %p1425_p10 = pneg %p1767_p8 }
  0x1f   : > { %s1763_s10 = scalar_lea.hbm %s2320_s0, %s1153_s6  ;;  %s1428_s9 = scalar_lea.hbm %s2320_s0, 8192 }
  0x20   : > { %s1423_s8 = scalar_lea.hbm %s1763_s10, 4096  ;;  %p1429_p13 = scmp.lt.u32.totalorder %s1763_s10, %s2320_s0 }
  0x21   : > { %p1424_p9 = scmp.ne.s32.totalorder %s1763_s10, %s1423_s8  ;;  %p1430_p0 = scmp.lt.u32.totalorder %s1428_s9, %s1423_s8 }
  0x22   : > { %p1432_p5 = scmp.lt.u32.totalorder %s1423_s8, %s1763_s10 }
  0x23   : > { %p1426_p11 = pnand %p1425_p10, %p1424_p9  ;;  %p1431_p2 = por %p1430_p0, %p1429_p13 }
  0x25   : > { %p1427_p12 = pneg %p1426_p11  ;;  %p1433_p7 = por %p1432_p5, %p1431_p2 }
  0x27   : > { %p1434_p1 = pnand %p1433_p7, %p1427_p12 }
  0x29   : > { %1437 = shalt.err (!%p1434_p1)
}
  0x2a   : > { %s1438_s5 = scalar_lea.vmem %s1771_s18, 4096  ;;  %s1635_s6 = smov [#allocation3]  }
  0x2b   : > { %p1439_p9 = scmp.ne.s32.totalorder %s1771_s18, %s1438_s5  ;;  %s1443_s7 = sshll.u32 %s1635_s6, 4  ;;  %s1444_s7 = int_to_ptr.vmem [resolvable:$false] %s1443_s7 }
  0x2c   : > { %s1445_s27 = scalar_lea.vmem %s1444_s7, 8192  ;;  %p1446_p4 = scmp.lt.s32.totalorder %s1771_s18, %s1444_s7 }
  0x2d   : > { %p1441_p11 = pnand %p1439_p9, %p1425_p10  ;;  %p1447_p13 = scmp.lt.s32.totalorder %s1445_s27, %s1438_s5 }
  0x2f   : > { %p1442_p6 = pneg %p1441_p11  ;;  %p1448_p0 = por %p1447_p13, %p1446_p4 }
  0x31   : > { %p1449_p2 = pnand %p1448_p0, %p1442_p6 }
  0x33   : > { %1452 = shalt.err (!%p1449_p2)
}
  0x34   : > { %s1636_s8 = smov 256   ;;  %s1637_s9 = smov 16  }
  0x35   : > { %1213 = dma.hbm_to_vmem [thread:$0]  (!%p1767_p8), %s1763_s10, 4096, %s1771_s18, %s1773_s28, %s1636_s8, %s1636_s8, %s1637_s9  }
  0x36   : > { %p1092_p1 = scmp.ge.s32.totalorder %s1633_s25, 1  ;;  %p197_p4 = scmp.lt.s32.totalorder %s1633_s25, 7 }
  0x37   : > { %s1082_s5 = sadd.s32 4294967294, %s1633_s25   ;;  %s31_s6 = sadd.s32 1, %s1625_s23 }
  0x38   : > { %p1803_p6 = pnand %p1092_p1, %p197_p4  ;;  %s88_s7 = sadd.s32 1, %s1601_s17 }
  0x39   : > { %p32_p7 = scmp.ge.s32.totalorder %s31_s6, 3  ;;  %p95_p10 = scmp.ne.s32.totalorder %s1601_s17, %s1597_s16 }
  0x3a   : > { %p101_p12 = scmp.ne.s32.totalorder %s1597_s16, %s1593_s15  ;;  %s116_s26 = sadd.s32 1, %s1589_s14 }
  0x3b   : > { %s2363_s6 = smov (%p32_p7, %s31_s6), 0  ;;  %s2324_s28 = sadd.s32 1, %s1629_s24 }
  0x3c   : > { %2323 = sst [smem:[#allocation14_spill]] %s2363_s6  ;;  %s2365_s28 = smov (!%p32_p7, %s2324_s28), %s1629_s24 }
  0x3d   : > { %s85_s10 = ssub.s32 %s1625_s23, %s2363_s6  ;;  %p2325_p8 = scmp.eq.s32.totalorder %s1633_s25, 0 }
  0x3e   : > { %p36_p9 = scmp.ge.s32.totalorder %s2365_s28, 2  ;;  %p86_p11 = scmp.eq.s32.totalorder %s85_s10, 0 }
  0x3f   : > { %p1824_p5 = por %p95_p10, %p2325_p8  ;;  %p1830_p13 = por %p101_p12, %p1741_p3 }
  0x40   : > { %p126_p0 = scmp.ne.s32.totalorder %s1589_s14, %s1585_s13  ;;  %s2367_s28 = smov (%p36_p9, %s2365_s28), 0 }
  0x41   : > { %s2327_s15 = scalar_select %p1830_p13, 1, 0 }
  0x42   : > { %2328 = sst [smem:[#allocation15_spill]] %s2367_s28  ;;  %s38_s8 = ssub.s32 %s1629_s24, %s2367_s28 }
  0x43   : > { %s1839_s27 = scalar_select %p86_p11, %s1601_s17, %s88_s7  }
  0x44   : > { %p2330_p2 = scmp.ne.s32.totalorder %s2318_s30, 0  ;;  %p39_p4 = scmp.eq.s32.totalorder %s38_s8, 0 }
  0x45   : > { %2329 = sst [smem:[#allocation16_spill]] %s1839_s27  ;;  %s113_s29 = sor.u32 %s85_s10, %s38_s8 }
  0x46   : > { %p1845_p1 = por %p2330_p2, %p126_p0  ;;  %p114_p3 = scmp.eq.s32.totalorder %s113_s29, 0 }
  0x47   : > { %p132_p7 = scmp.ne.s32.totalorder %s1585_s13, %s1581_s12  ;;  %s2333_s0 = sadd.s32 1, %s1613_s20 }
  0x48   : > { %s2331_s9 = scalar_select %p1845_p1, 1, 0 }
  0x49   : > { %s1854_s6 = scalar_select %p39_p4, %s1613_s20, %s2333_s0  }
  0x4a   : > { %2332 = sst [smem:[#allocation17_spill]] %s2331_s9  ;;  %p133_p10 = scmp.eq.s32.totalorder %s1082_s5, 5 }
  0x4b   : > { %s1857_s3 = scalar_select %p114_p3, %s1589_s14, %s116_s26  }
  0x4c   : > { %s178_s7 = sand.u32 1, %s1601_s17   ;;  %p1860_p12 = por %p133_p10, %p132_p7 }
  0x4d   : > { %s1089_s27 = sshll.u32 %s178_s7, 8  ;;  %s1154_s28 = sshll.u32 %s1625_s23, 7 }
  0x4e   : > { %s2334_s30 = scalar_select %p1860_p12, 1, 0 }
  0x4f   : > { %s182_s24 = scalar_lea.vmem [#allocation6], %s1089_s27  ;;  %s1868_s10 = scalar_lea.hbm %s2299_s2, %s1154_s28 }
  0x50   : > { %s189_s9 = sshll.u32 %s182_s24, 4  ;;  %p2335_p8 = scmp.lt.s32.totalorder %s1633_s25, 6  ;;  %s1870_s9 = int_to_ptr.vmem [resolvable:$true] %s189_s9 }
  0x51   : > { %s1880_s24 = scalar_lea.sflag [#allocation7], %s178_s7  ;;  %s1453_s5 = scalar_lea.hbm %s1868_s10, 4096 }
  0x52   : > { %p1876_p9 = pnand %p2335_p8, %p1824_p5  ;;  %p1454_p11 = scmp.ne.s32.totalorder %s1868_s10, %s1453_s5 }
  0x53   : > { %s1458_s26 = scalar_lea.hbm %s2299_s2, 12288  ;;  %p1459_p5 = scmp.lt.u32.totalorder %s1868_s10, %s2299_s2 }
  0x54   : > { %p1455_p0 = pneg %p1876_p9  ;;  %p1460_p3 = scmp.lt.u32.totalorder %s1458_s26, %s1453_s5 }
  0x55   : > { %p1462_p10 = scmp.lt.u32.totalorder %s1453_s5, %s1868_s10 }
  0x56   : > { %p1456_p2 = pnand %p1455_p0, %p1454_p11  ;;  %p1461_p7 = por %p1460_p3, %p1459_p5 }
  0x58   : > { %p1457_p4 = pneg %p1456_p2  ;;  %p1463_p8 = por %p1462_p10, %p1461_p7 }
  0x5a   : > { %p1464_p12 = pnand %p1463_p8, %p1457_p4 }
  0x5c   : > { %1467 = shalt.err (!%p1464_p12)
}
  0x5d   : > { %s1468_s27 = scalar_lea.vmem %s1870_s9, 4096  ;;  %s1638_s8 = smov [#allocation6]  }
  0x5e   : > { %p1469_p11 = scmp.ne.s32.totalorder %s1870_s9, %s1468_s27  ;;  %s1473_s29 = sshll.u32 %s1638_s8, 4  ;;  %s1474_s29 = int_to_ptr.vmem [resolvable:$false] %s1473_s29 }
  0x5f   : > { %s1475_s7 = scalar_lea.vmem %s1474_s29, 8192  ;;  %p1476_p13 = scmp.lt.s32.totalorder %s1870_s9, %s1474_s29 }
  0x60   : > { %p1471_p2 = pnand %p1469_p11, %p1455_p0  ;;  %p1477_p5 = scmp.lt.s32.totalorder %s1475_s7, %s1468_s27 }
  0x62   : > { %p1472_p1 = pneg %p1471_p2  ;;  %p1478_p3 = por %p1477_p5, %p1476_p13 }
  0x64   : > { %p1479_p7 = pnand %p1478_p3, %p1472_p1 }
  0x66   : > { %1482 = shalt.err (!%p1479_p7)
}
  0x67   : > { %s1639_s5 = smov 384   ;;  %s1640_s1 = smov 128  }
  0x68   : > { %s1641_s22 = smov 8   ;;  %201 = sbr.rel (%p1803_p6) target bundleno = 642 (0x282), region = 32 }
  0x69   : > { %1216 = dma.hbm_to_vmem [thread:$0]  (!%p1876_p9), %s1868_s10, 4096, %s1870_s9, %s1880_s24, %s1639_s5, %s1640_s1, %s1641_s22  }
  0x6a   : > { %s203_s26 = sand.u32 (!%p1803_p6), 1, %s1609_s19   ;;  %p2337_p13 = scmp.ne.s32.totalorder (!%p1803_p6), %s2319_s4, 0 }
  0x6b   : > { %s1093_s28 = sshll.u32 (!%p1803_p6), %s203_s26, 8  ;;  %s204_s18 = scalar_lea.sflag (!%p1803_p6), [#allocation4], %s203_s26 }
  0x6c   : > { %s1911_s27 = scalar_lea.vmem (!%p1803_p6), [#allocation3], %s1093_s28 }
  0x6f   : > { %1568 = dma.done.wait (%p2337_p13), %s204_s18, 4096  }
  0x70   : > { %1570 = vsyncadd (%p2337_p13), %s204_s18, 4294963200  ;;  %s212_s8 = sand.u32 1, %s1597_s16   ;;  %p2338_p6 = scmp.ne.s32.totalorder %s2327_s15, 0 }
  0x71   : > { %s1094_s0 = sshll.u32 %s212_s8, 8  ;;  %s213_s9 = scalar_lea.sflag [#allocation7], %s212_s8 }
  0x72   : > { %s1918_s10 = scalar_lea.vmem [#allocation6], %s1094_s0 }
  0x73   : > { %1572 = dma.done.wait (%p2338_p6), %s213_s9, 4096  }
  0x74   : > { %1574 = vsyncadd (%p2338_p6), %s213_s9, 4294963200  ;;  %s241_s11 = sand.u32 1, %s1585_s13   ;;  %p1096_p1 = scmp.ne.s32.totalorder %s1617_s21, 0 }
  0x75   : > { %s1095_s24 = sshll.u32 %s241_s11, 7  ;;  %v1931_v0 = vld [vmem:[%s1911_s27 + $0x20] sm:$0xff] (!%p1096_p1)  ;;  %v1934_v1 = vld [vmem:[%s1911_s27 + $0x28] sm:$0xff] (!%p1096_p1)  ;;  %v1949_v7 = vld [vmem:[%s1911_s27 + $0x30] sm:$0xff] (!%p1096_p1)  ;;  %s2339_s7 = sld [smem:[#allocation19_spill]] (!%p1096_p1) }
  0x76   : > { %s1927_s29 = scalar_lea.vmem [#allocation8], %s1095_s24  ;;  %251 = sbr.rel (%p1096_p1) target bundleno = 320 (0x140), region = 44  ;;  %v1937_v2 = vld [vmem:[%s1911_s27] sm:$0xff] (!%p1096_p1)  ;;  %v289_v3 = vmul.f32 (!%p1096_p1), %v1931_v0, %v1931_v0  ;;  %v290_v4 = vmul.f32 (!%p1096_p1), %v1934_v1, %v1934_v1  ;;  %v1944_v5 = vld [vmem:[%s1911_s27 + $0x8] sm:$0xff] (!%p1096_p1)  ;;  %v1952_v8 = vld [vmem:[%s1911_s27 + $0x38] sm:$0xff] (!%p1096_p1)  ;;  %v291_v10 = vmul.f32 (!%p1096_p1), %v1949_v7, %v1949_v7 }
  0x77   : > { %v285_v6 = vmul.f32 (!%p1096_p1), %v1937_v2, %v1937_v2  ;;  %v286_v9 = vmul.f32 (!%p1096_p1), %v1944_v5, %v1944_v5  ;;  %v292_v11 = vmul.f32 (!%p1096_p1), %v1952_v8, %v1952_v8  ;;  %v1961_v12 = vld [vmem:[%s1911_s27 + $0x10] sm:$0xff] (!%p1096_p1)  ;;  %v1964_v13 = vld [vmem:[%s1911_s27 + $0x18] sm:$0xff] (!%p1096_p1)  ;;  %v1977_v19 = vld [vmem:[%s1911_s27 + $0x40] sm:$0xff] (!%p1096_p1) }
  0x78   : > { %v1967_v14 = vld [vmem:[%s1911_s27 + $0x50] sm:$0xff] (!%p1096_p1)  ;;  %v323_v15 = vadd.f32 (!%p1096_p1), %v290_v4, %v289_v3  ;;  %v287_v16 = vmul.f32 (!%p1096_p1), %v1961_v12, %v1961_v12  ;;  %v288_v17 = vmul.f32 (!%p1096_p1), %v1964_v13, %v1964_v13  ;;  %v1974_v18 = vld [vmem:[%s1911_s27 + $0x58] sm:$0xff] (!%p1096_p1)  ;;  %v1980_v20 = vld [vmem:[%s1911_s27 + $0x48] sm:$0xff] (!%p1096_p1)  ;;  %v293_v26 = vmul.f32 (!%p1096_p1), %v1977_v19, %v1977_v19 }
  0x79   : > { %v317_v21 = vadd.f32 (!%p1096_p1), %v286_v9, %v285_v6  ;;  %v326_v22 = vadd.f32 (!%p1096_p1), %v292_v11, %v291_v10  ;;  %v295_v23 = vmul.f32 (!%p1096_p1), %v1967_v14, %v1967_v14  ;;  %v296_v24 = vmul.f32 (!%p1096_p1), %v1974_v18, %v1974_v18  ;;  %v1991_v28 = vld [vmem:[%s1911_s27 + $0x70] sm:$0xff] (!%p1096_p1)  ;;  %v1994_v29 = vld [vmem:[%s1911_s27 + $0x78] sm:$0xff] (!%p1096_p1)  ;;  %v1997_v30 = vld [vmem:[%s1911_s27 + $0x60] sm:$0xff] (!%p1096_p1) }
  0x7a   : > { %324 = vadd.xlane.f32.xlu1 (!%p1096_p1), %v323_v15  ;;  %v320_v25 = vadd.f32 (!%p1096_p1), %v288_v17, %v287_v16  ;;  %v294_v27 = vmul.f32 (!%p1096_p1), %v1980_v20, %v1980_v20  ;;  %v2000_v31 = vld [vmem:[%s1911_s27 + $0x68] sm:$0xff] (!%p1096_p1)  ;;  %v299_v33 = vmul.f32 (!%p1096_p1), %v1991_v28, %v1991_v28  ;;  %v300_v34 = vmul.f32 (!%p1096_p1), %v1994_v29, %v1994_v29  ;;  %v2011_v38 = vld [vmem:[%s1911_s27 + $0x90] sm:$0xff] (!%p1096_p1)  ;;  %v2014_v39 = vld [vmem:[%s1911_s27 + $0x98] sm:$0xff] (!%p1096_p1) }
  0x7b   : > { %318 = vadd.xlane.f32.xlu0 (!%p1096_p1), %v317_v21  ;;  %v332_v32 = vadd.f32 (!%p1096_p1), %v296_v24, %v295_v23  ;;  %v297_v36 = vmul.f32 (!%p1096_p1), %v1997_v30, %v1997_v30  ;;  %v298_v37 = vmul.f32 (!%p1096_p1), %v2000_v31, %v2000_v31  ;;  %v2017_v40 = vld [vmem:[%s1911_s27 + $0x80] sm:$0xff] (!%p1096_p1)  ;;  %v2020_v41 = vld [vmem:[%s1911_s27 + $0x88] sm:$0xff] (!%p1096_p1)  ;;  %v303_v43 = vmul.f32 (!%p1096_p1), %v2011_v38, %v2011_v38  ;;  %v2031_v48 = vld [vmem:[%s1911_s27 + $0xb0] sm:$0xff] (!%p1096_p1) }
  0x7c   : > { %v329_v35 = vadd.f32 (!%p1096_p1), %v294_v27, %v293_v26  ;;  %v338_v42 = vadd.f32 (!%p1096_p1), %v300_v34, %v299_v33  ;;  %v304_v44 = vmul.f32 (!%p1096_p1), %v2014_v39, %v2014_v39  ;;  %v301_v46 = vmul.f32 (!%p1096_p1), %v2017_v40, %v2017_v40  ;;  %v2034_v49 = vld [vmem:[%s1911_s27 + $0xb8] sm:$0xff] (!%p1096_p1)  ;;  %v2037_v50 = vld [vmem:[%s1911_s27 + $0xa0] sm:$0xff] (!%p1096_p1)  ;;  %v2040_v51 = vld [vmem:[%s1911_s27 + $0xa8] sm:$0xff] (!%p1096_p1) }
  0x7d   : > { %v335_v45 = vadd.f32 %v298_v37, %v297_v36  ;;  %v302_v47 = vmul.f32 %v2020_v41, %v2020_v41  ;;  %v307_v53 = vmul.f32 %v2031_v48, %v2031_v48  ;;  %v308_v54 = vmul.f32 %v2034_v49, %v2034_v49  ;;  %v2051_v58 = vld [vmem:[%s1911_s27 + $0xd0] sm:$0xff]  ;;  %v2054_v59 = vld [vmem:[%s1911_s27 + $0xd8] sm:$0xff]  ;;  %v2057_v60 = vld [vmem:[%s1911_s27 + $0xc0] sm:$0xff] }
  0x7e   : > { %327 = vadd.xlane.f32.xlu1 %v326_v22  ;;  %v344_v52 = vadd.f32 %v304_v44, %v303_v43  ;;  %v305_v56 = vmul.f32 %v2037_v50, %v2037_v50  ;;  %v306_v57 = vmul.f32 %v2040_v51, %v2040_v51  ;;  %v2060_v61 = vld [vmem:[%s1911_s27 + $0xc8] sm:$0xff]  ;;  %v311_v63 = vmul.f32 %v2051_v58, %v2051_v58  ;;  %v2071_v10 = vld [vmem:[%s1911_s27 + $0xf0] sm:$0xff]  ;;  %v2074_v11 = vld [vmem:[%s1911_s27 + $0xf8] sm:$0xff] }
  0x7f   : > { %321 = vadd.xlane.f32.xlu0 %v320_v25  ;;  %v341_v55 = vadd.f32 %v302_v47, %v301_v46  ;;  %v350_v62 = vadd.f32 %v308_v54, %v307_v53  ;;  %v312_v3 = vmul.f32 %v2054_v59, %v2054_v59  ;;  %v309_v6 = vmul.f32 %v2057_v60, %v2057_v60  ;;  %v2077_v15 = vld [vmem:[%s1911_s27 + $0xe0] sm:$0xff]  ;;  %v2080_v16 = vld [vmem:[%s1911_s27 + $0xe8] sm:$0xff] }
  0x80   : > { %v347_v4 = vadd.f32 %v306_v57, %v305_v56  ;;  %v310_v9 = vmul.f32 %v2060_v61, %v2060_v61  ;;  %v315_v21 = vmul.f32 %v2071_v10, %v2071_v10  ;;  %v316_v22 = vmul.f32 %v2074_v11, %v2074_v11 }
  0x81   : > { %v356_v17 = vadd.f32 %v312_v3, %v311_v63  ;;  %v313_v24 = vmul.f32 %v2077_v15, %v2077_v15  ;;  %v314_v25 = vmul.f32 %v2080_v16, %v2080_v16  ;;  %v447_v36 = vlaneseq }
  0x82   : > { %333 = vadd.xlane.f32.xlu1 %v332_v32  ;;  %v353_v23 = vadd.f32 %v310_v9, %v309_v6  ;;  %v362_v26 = vadd.f32 %v316_v22, %v315_v21 }
  0x83   : > { %330 = vadd.xlane.f32.xlu0 %v329_v35  ;;  %v359_v27 = vadd.f32 %v314_v25, %v313_v24  ;;  %v448_v47 = vshrl.u32 %v447_v36, 7 }
  0x85   : > { %v453_v63 = vsub.s32 1, %v448_v47 }
  0x86   : > { %339 = vadd.xlane.f32.xlu1 %v338_v42 }
  0x87   : > { %336 = vadd.xlane.f32.xlu0 %v335_v45 }
  0x8a   : > { %345 = vadd.xlane.f32.xlu1 %v344_v52 }
  0x8b   : > { %342 = vadd.xlane.f32.xlu0 %v341_v55 }
  0x8e   : > { %351 = vadd.xlane.f32.xlu1 %v350_v62  ;;  %v449_v62 = vsub.s32 0, %v448_v47 }
  0x8f   : > { %348 = vadd.xlane.f32.xlu0 %v347_v4  ;;  %v284_v4 = vld [vmem:[%s2339_s7] sm:$0x3] }
  0x90   : > { %v2093_v24 = vrot.slane %v284_v4, %v449_v62  ;;  %v2095_v25 = vrot.slane %v284_v4, %v453_v63 }
  0x92   : > { %357 = vadd.xlane.f32.xlu1 %v356_v17 }
  0x93   : > { %354 = vadd.xlane.f32.xlu0 %v353_v23 }
  0x96   : > { %363 = vadd.xlane.f32.xlu1 %v362_v26 }
  0x97   : > { %360 = vadd.xlane.f32.xlu0 %v359_v27 }
 0x107   : > { %v325_v32 = vpop.xlane.xlu1 %324 }
 0x108   : > { %v368_v33 = vmul.f32 0.00390625, %v325_v32  ;;  %v319_v34 = vpop.xlane.xlu0 %318 }
 0x109   : > { %v366_v35 = vmul.f32 0.00390625, %v319_v34 }
 0x10a   : > { %v384_v37 = vadd.f32 1e-06, %v368_v33 }
 0x10b   : > { %v382_v42 = vadd.f32 1e-06, %v366_v35  ;;  %v328_v43 = vpop.xlane.xlu1 %327 }
 0x10c   : > { %1343 = vrsqrt.f32 %v384_v37  ;;  %v369_v44 = vmul.f32 0.00390625, %v328_v43  ;;  %v322_v45 = vpop.xlane.xlu0 %321 }
 0x10d   : > { %1345 = vrsqrt.f32 %v382_v42  ;;  %v367_v46 = vmul.f32 0.00390625, %v322_v45 }
 0x10e   : > { %v385_v52 = vadd.f32 1e-06, %v369_v44 }
 0x10f   : > { %v383_v53 = vadd.f32 1e-06, %v367_v46  ;;  %v334_v54 = vpop.xlane.xlu1 %333 }
 0x110   : > { %1347 = vrsqrt.f32 %v385_v52  ;;  %v371_v55 = vmul.f32 0.00390625, %v334_v54  ;;  %v331_v56 = vpop.xlane.xlu0 %330 }
 0x111   : > { %1349 = vrsqrt.f32 %v383_v53  ;;  %v370_v57 = vmul.f32 0.00390625, %v331_v56 }
 0x112   : > { %v387_v3 = vadd.f32 1e-06, %v371_v55 }
 0x113   : > { %v386_v6 = vadd.f32 1e-06, %v370_v57  ;;  %v340_v9 = vpop.xlane.xlu1 %339 }
 0x114   : > { %1351 = vrsqrt.f32 %v387_v3  ;;  %v373_v17 = vmul.f32 0.00390625, %v340_v9  ;;  %v337_v21 = vpop.xlane.xlu0 %336 }
 0x115   : > { %1353 = vrsqrt.f32 %v386_v6  ;;  %v372_v22 = vmul.f32 0.00390625, %v337_v21 }
 0x116   : > { %v1344_v23 = vpop.eup %1343  ;;  %v389_v26 = vadd.f32 1e-06, %v373_v17 }
 0x117   : > { %v1346_v27 = vpop.eup %1345  ;;  %v418_v32 = vmul.f32 %v1344_v23, %v1931_v0  ;;  %v419_v33 = vmul.f32 %v1344_v23, %v1934_v1  ;;  %v388_v34 = vadd.f32 1e-06, %v372_v22  ;;  %v346_v35 = vpop.xlane.xlu1 %345 }
 0x118   : > { %v414_v36 = vmul.f32 %v1346_v27, %v1937_v2  ;;  %1355 = vrsqrt.f32 %v389_v26  ;;  %v375_v37 = vmul.f32 0.00390625, %v346_v35  ;;  %v343_v42 = vpop.xlane.xlu0 %342  ;;  %v415_v47 = vmul.f32 %v1346_v27, %v1944_v5 }
 0x119   : > { %1357 = vrsqrt.f32 %v388_v34  ;;  %v374_v43 = vmul.f32 0.00390625, %v343_v42  ;;  %v461_v45 = vmul.f32 %v2093_v24, %v418_v32  ;;  %v462_v46 = vmul.f32 %v2095_v25, %v419_v33 }
 0x11a   : > { %v1348_v44 = vpop.eup %1347  ;;  %v391_v52 = vadd.f32 1e-06, %v375_v37  ;;  %v457_v1 = vmul.f32 %v2093_v24, %v414_v36 }
 0x11b   : > { %v1350_v0 = vpop.eup %1349  ;;  %v420_v53 = vmul.f32 %v1348_v44, %v1949_v7  ;;  %v421_v2 = vmul.f32 %v1348_v44, %v1952_v8  ;;  %v390_v54 = vadd.f32 1e-06, %v374_v43  ;;  %v352_v55 = vpop.xlane.xlu1 %351  ;;  %v458_v7 = vmul.f32 %v2095_v25, %v415_v47 }
 0x11c   : > { %v416_v56 = vmul.f32 %v1350_v0, %v1961_v12  ;;  %v417_v57 = vmul.f32 %v1350_v0, %v1964_v13  ;;  %1359 = vrsqrt.f32 %v391_v52  ;;  %v377_v62 = vmul.f32 0.00390625, %v352_v55  ;;  %v349_v63 = vpop.xlane.xlu0 %348 }
 0x11d   : > { %v463_v3 = vmul.f32 %v2093_v24, %v420_v53  ;;  %v464_v5 = vmul.f32 %v2095_v25, %v421_v2  ;;  %1361 = vrsqrt.f32 %v390_v54  ;;  %v376_v4 = vmul.f32 0.00390625, %v349_v63 }
 0x11e   : > { %v1352_v6 = vpop.eup %1351  ;;  %v459_v8 = vmul.f32 %v2093_v24, %v416_v56  ;;  %v460_v9 = vmul.f32 %v2095_v25, %v417_v57  ;;  %v393_v17 = vadd.f32 1e-06, %v377_v62 }
 0x11f   : > { %v1354_v12 = vpop.eup %1353  ;;  %v491_v21 = vpack.c.bf16 %v463_v3, %v461_v45  ;;  %v492_v13 = vpack.c.bf16 %v464_v5, %v462_v46  ;;  %v424_v22 = vmul.f32 %v1352_v6, %v1967_v14  ;;  %v425_v23 = vmul.f32 %v1352_v6, %v1974_v18  ;;  %v358_v26 = vpop.xlane.xlu1 %357 }
 0x120   : > { %v489_v27 = vpack.c.bf16 %v459_v8, %v457_v1  ;;  %v490_v32 = vpack.c.bf16 %v460_v9, %v458_v7  ;;  %v422_v33 = vmul.f32 %v1354_v12, %v1977_v19  ;;  %v423_v34 = vmul.f32 %v1354_v12, %v1980_v20  ;;  %v355_v35 = vpop.xlane.xlu0 %354 }
 0x121   : > { %507 = vst [vmem:[#allocation2 + $0x10] sm:$0xff] %v491_v21  ;;  %508 = vst [vmem:[#allocation2 + $0x18] sm:$0xff] %v492_v13  ;;  %v467_v36 = vmul.f32 %v2093_v24, %v424_v22  ;;  %v468_v37 = vmul.f32 %v2095_v25, %v425_v23  ;;  %1363 = vrsqrt.f32 %v393_v17  ;;  %v392_v42 = vadd.f32 1e-06, %v376_v4 }
 0x122   : > { %v1356_v43 = vpop.eup %1355  ;;  %505 = vst [vmem:[#allocation2] sm:$0xff] %v489_v27  ;;  %506 = vst [vmem:[#allocation2 + $0x8] sm:$0xff] %v490_v32  ;;  %v465_v14 = vmul.f32 %v2093_v24, %v422_v33  ;;  %v466_v18 = vmul.f32 %v2095_v25, %v423_v34  ;;  %v379_v44 = vmul.f32 0.00390625, %v358_v26  ;;  %v378_v19 = vmul.f32 0.00390625, %v355_v35 }
 0x123   : > { %v1358_v45 = vpop.eup %1357  ;;  %v428_v20 = vmul.f32 %v1356_v43, %v1991_v28  ;;  %v429_v46 = vmul.f32 %v1356_v43, %v1994_v29  ;;  %1365 = vrsqrt.f32 %v392_v42  ;;  %v364_v47 = vpop.xlane.xlu1 %363 }
 0x124   : > { %v493_v52 = vpack.c.bf16 %v467_v36, %v465_v14  ;;  %v494_v0 = vpack.c.bf16 %v468_v37, %v466_v18  ;;  %v426_v1 = vmul.f32 %v1358_v45, %v1997_v30  ;;  %v427_v53 = vmul.f32 %v1358_v45, %v2000_v31  ;;  %v361_v2 = vpop.xlane.xlu0 %360 }
 0x125   : > { %v471_v54 = vmul.f32 %v2093_v24, %v428_v20  ;;  %v472_v55 = vmul.f32 %v2095_v25, %v429_v46  ;;  %v395_v56 = vadd.f32 1e-06, %v379_v44  ;;  %v394_v57 = vadd.f32 1e-06, %v378_v19 }
 0x126   : > { %v1360_v62 = vpop.eup %1359  ;;  %509 = vst [vmem:[#allocation2 + $0x20] sm:$0xff] %v493_v52  ;;  %510 = vst [vmem:[#allocation2 + $0x28] sm:$0xff] %v494_v0  ;;  %v469_v28 = vmul.f32 %v2093_v24, %v426_v1  ;;  %v470_v29 = vmul.f32 %v2095_v25, %v427_v53  ;;  %v381_v63 = vmul.f32 0.00390625, %v364_v47  ;;  %v380_v3 = vmul.f32 0.00390625, %v361_v2 }
 0x127   : > { %v1362_v5 = vpop.eup %1361  ;;  %v432_v30 = vmul.f32 %v1360_v62, %v2011_v38  ;;  %v433_v31 = vmul.f32 %v1360_v62, %v2014_v39  ;;  %1367 = vrsqrt.f32 %v395_v56 }
 0x128   : > { %v495_v4 = vpack.c.bf16 %v471_v54, %v469_v28  ;;  %v496_v6 = vpack.c.bf16 %v472_v55, %v470_v29  ;;  %v430_v7 = vmul.f32 %v1362_v5, %v2017_v40  ;;  %v431_v8 = vmul.f32 %v1362_v5, %v2020_v41 }
 0x129   : > { %v475_v9 = vmul.f32 %v2093_v24, %v432_v30  ;;  %v476_v17 = vmul.f32 %v2095_v25, %v433_v31  ;;  %1369 = vrsqrt.f32 %v394_v57  ;;  %v397_v12 = vadd.f32 1e-06, %v381_v63 }
 0x12a   : > { %511 = vst [vmem:[#allocation2 + $0x30] sm:$0xff] %v495_v4  ;;  %512 = vst [vmem:[#allocation2 + $0x38] sm:$0xff] %v496_v6  ;;  %v473_v21 = vmul.f32 %v2093_v24, %v430_v7  ;;  %v474_v38 = vmul.f32 %v2095_v25, %v431_v8  ;;  %v396_v39 = vadd.f32 1e-06, %v380_v3 }
 0x12b   : > { %v1364_v13 = vpop.eup %1363  ;;  %1371 = vrsqrt.f32 %v397_v12 }
 0x12c   : > { %v497_v22 = vpack.c.bf16 %v475_v9, %v473_v21  ;;  %v498_v23 = vpack.c.bf16 %v476_v17, %v474_v38  ;;  %v436_v40 = vmul.f32 %v1364_v13, %v2031_v48  ;;  %v437_v41 = vmul.f32 %v1364_v13, %v2034_v49 }
 0x12d   : > { %v1366_v26 = vpop.eup %1365  ;;  %1373 = vrsqrt.f32 %v396_v39 }
 0x12e   : > { %513 = vst [vmem:[#allocation2 + $0x40] sm:$0xff] %v497_v22  ;;  %514 = vst [vmem:[#allocation2 + $0x48] sm:$0xff] %v498_v23  ;;  %v479_v27 = vmul.f32 %v2093_v24, %v436_v40  ;;  %v480_v32 = vmul.f32 %v2095_v25, %v437_v41  ;;  %v434_v33 = vmul.f32 %v1366_v26, %v2037_v50 }
 0x12f   : > { %v435_v34 = vmul.f32 %v1366_v26, %v2040_v51 }
 0x130   : > { %v477_v35 = vmul.f32 %v2093_v24, %v434_v33 }
 0x131   : > { %v478_v36 = vmul.f32 %v2095_v25, %v435_v34  ;;  %v1368_v37 = vpop.eup %1367 }
 0x132   : > { %v499_v48 = vpack.c.bf16 %v479_v27, %v477_v35  ;;  %v440_v49 = vmul.f32 %v1368_v37, %v2051_v58  ;;  %v441_v43 = vmul.f32 %v1368_v37, %v2054_v59 }
 0x133   : > { %v500_v42 = vpack.c.bf16 %v480_v32, %v478_v36  ;;  %v1370_v14 = vpop.eup %1369 }
 0x134   : > { %515 = vst [vmem:[#allocation2 + $0x50] sm:$0xff] %v499_v48  ;;  %v483_v18 = vmul.f32 %v2093_v24, %v440_v49  ;;  %v484_v50 = vmul.f32 %v2095_v25, %v441_v43  ;;  %v438_v51 = vmul.f32 %v1370_v14, %v2057_v60  ;;  %v439_v44 = vmul.f32 %v1370_v14, %v2060_v61 }
 0x135   : > { %516 = vst [vmem:[#allocation2 + $0x58] sm:$0xff] %v500_v42  ;;  %v1372_v19 = vpop.eup %1371 }
 0x136   : > { %v481_v45 = vmul.f32 %v2093_v24, %v438_v51  ;;  %v482_v20 = vmul.f32 %v2095_v25, %v439_v44  ;;  %v444_v58 = vmul.f32 %v1372_v19, %v2071_v10  ;;  %v445_v59 = vmul.f32 %v1372_v19, %v2074_v11 }
 0x137   : > { %v1374_v46 = vpop.eup %1373 }
 0x138   : > { %v501_v47 = vpack.c.bf16 %v483_v18, %v481_v45  ;;  %v502_v52 = vpack.c.bf16 %v484_v50, %v482_v20  ;;  %v487_v0 = vmul.f32 %v2093_v24, %v444_v58  ;;  %v488_v1 = vmul.f32 %v2095_v25, %v445_v59 }
 0x139   : > { %v442_v60 = vmul.f32 %v1374_v46, %v2077_v15  ;;  %v443_v61 = vmul.f32 %v1374_v46, %v2080_v16 }
 0x13a   : > { %517 = vst [vmem:[#allocation2 + $0x60] sm:$0xff] %v501_v47  ;;  %518 = vst [vmem:[#allocation2 + $0x68] sm:$0xff] %v502_v52 }
 0x13b   : > { %v485_v53 = vmul.f32 %v2093_v24, %v442_v60  ;;  %v486_v2 = vmul.f32 %v2095_v25, %v443_v61 }
 0x13d   : > { %v503_v10 = vpack.c.bf16 %v487_v0, %v485_v53  ;;  %v504_v54 = vpack.c.bf16 %v488_v1, %v486_v2 }
 0x13f   : > { %519 = vst [vmem:[#allocation2 + $0x70] sm:$0xff] %v503_v10  ;;  %520 = vst [vmem:[#allocation2 + $0x78] sm:$0xff] %v504_v54 }
 0x140 PF: > { %v1375_v11 = vld [vmem:[%s1918_s10 + $0x4] ss:$8 sps:$4 sm:$0xff]   ;;  %v1377_v15 = vld [vmem:[%s1918_s10] ss:$8 sps:$4 sm:$0xff]   ;;  %v1378_v16 = vld [vmem:[%s1918_s10 + $0x14] ss:$8 sps:$4 sm:$0xff]  }
 0x141   : > { %729 = vmatprep.subr.bf16.mxu0 %v1375_v11  ;;  %1171 = vmatprep.subr.bf16.mxu1 %v1375_v11  ;;  %v1380_v24 = vld [vmem:[%s1918_s10 + $0x10] ss:$8 sps:$4 sm:$0xff]   ;;  %v1381_v25 = vld [vmem:[%s1918_s10 + $0x24] ss:$8 sps:$4 sm:$0xff]   ;;  %v1383_v55 = vld [vmem:[%s1918_s10 + $0x20] ss:$8 sps:$4 sm:$0xff]  }
 0x142   : > { %730 = vmatpush1.bf16.msra.mxu0 %v1377_v15  ;;  %1187 = vmatpush1.bf16.msra.mxu1 %v1377_v15  ;;  %v1384_v56 = vld [vmem:[%s1918_s10 + $0x34] ss:$8 sps:$4 sm:$0xff]   ;;  %v1386_v57 = vld [vmem:[%s1918_s10 + $0x30] ss:$8 sps:$4 sm:$0xff]   ;;  %v1387_v62 = vld [vmem:[%s1918_s10 + $0x44] ss:$8 sps:$4 sm:$0xff]  }
 0x143   : > { %731 = vmatprep.subr.bf16.mxu0 %v1378_v16  ;;  %1172 = vmatprep.subr.bf16.mxu1 %v1378_v16  ;;  %v1389_v28 = vld [vmem:[%s1918_s10 + $0x40] ss:$8 sps:$4 sm:$0xff]   ;;  %v1390_v29 = vld [vmem:[%s1918_s10 + $0x54] ss:$8 sps:$4 sm:$0xff]   ;;  %v1392_v63 = vld [vmem:[%s1918_s10 + $0x50] ss:$8 sps:$4 sm:$0xff]  }
 0x144   : > { %v1393_v3 = vld [vmem:[%s1918_s10 + $0x64] ss:$8 sps:$4 sm:$0xff]   ;;  %v1395_v31 = vld [vmem:[%s1918_s10 + $0x60] ss:$8 sps:$4 sm:$0xff]   ;;  %v1396_v4 = vld [vmem:[%s1918_s10 + $0x74] ss:$8 sps:$4 sm:$0xff]  }
 0x145   : > { %v522_v5 = vld [vmem:[#allocation2 + $0x8] sm:$0xff]  ;;  %v1398_v6 = vld [vmem:[%s1918_s10 + $0x70] ss:$8 sps:$4 sm:$0xff]   ;;  %v1402_v9 = vld [vmem:[%s1918_s10 + $0x94] ss:$8 sps:$4 sm:$0xff]   ;;  %s2340_s5 = sld [smem:[#allocation12_spill]] }
 0x146   : > { %732 = vmatpush1.bf16.msra.mxu0 %v1380_v24  ;;  %1188 = vmatpush1.bf16.msra.mxu1 %v1380_v24  ;;  %v530_v30 = vld [vmem:[#allocation2 + $0x48] sm:$0xff]  ;;  %v1404_v17 = vld [vmem:[%s1918_s10 + $0x90] ss:$8 sps:$4 sm:$0xff]   ;;  %v1408_v38 = vld [vmem:[%s1918_s10 + $0xb4] ss:$8 sps:$4 sm:$0xff]   ;;  %s1147_s22 = sshll.u32 %s1617_s21, 1 }
 0x147   : > { %733 = vmatprep.subr.bf16.mxu0 %v1381_v25  ;;  %1173 = vmatprep.subr.bf16.mxu1 %v1381_v25  ;;  %v1399_v7 = vld [vmem:[%s1918_s10 + $0x84] ss:$8 sps:$4 sm:$0xff]   ;;  %v1401_v8 = vld [vmem:[%s1918_s10 + $0x80] ss:$8 sps:$4 sm:$0xff]   ;;  %v1410_v39 = vld [vmem:[%s1918_s10 + $0xb0] ss:$8 sps:$4 sm:$0xff]  }
 0x148   : > { %761 = vmatprep.mubr.bf16.mxu0 %v522_v5  ;;  %801 = vmatprep.mubr.bf16.mxu1 %v530_v30  ;;  %v1405_v12 = vld [vmem:[%s1918_s10 + $0xa4] ss:$8 sps:$4 sm:$0xff]   ;;  %v1407_v21 = vld [vmem:[%s1918_s10 + $0xa0] ss:$8 sps:$4 sm:$0xff]   ;;  %v1414_v23 = vld [vmem:[%s1918_s10 + $0xd4] ss:$8 sps:$4 sm:$0xff]  }
 0x149   : > { %v1411_v13 = vld [vmem:[%s1918_s10 + $0xc4] ss:$8 sps:$4 sm:$0xff]   ;;  %v1413_v22 = vld [vmem:[%s1918_s10 + $0xc0] ss:$8 sps:$4 sm:$0xff]   ;;  %v1416_v40 = vld [vmem:[%s1918_s10 + $0xd0] ss:$8 sps:$4 sm:$0xff]  }
 0x14a   : > { %734 = vmatpush1.bf16.msra.mxu0 %v1383_v55  ;;  %1189 = vmatpush1.bf16.msra.mxu1 %v1383_v55  ;;  %v1417_v41 = vld [vmem:[%s1918_s10 + $0xe4] ss:$8 sps:$4 sm:$0xff]   ;;  %v1419_v26 = vld [vmem:[%s1918_s10 + $0xe0] ss:$8 sps:$4 sm:$0xff]   ;;  %v1420_v27 = vld [vmem:[%s1918_s10 + $0xf4] ss:$8 sps:$4 sm:$0xff]  }
 0x14b   : > { %735 = vmatprep.subr.bf16.mxu0 %v1384_v56  ;;  %1174 = vmatprep.subr.bf16.mxu1 %v1384_v56  ;;  %v1422_v32 = vld [vmem:[%s1918_s10 + $0xf0] ss:$8 sps:$4 sm:$0xff]   ;;  %v521_v33 = vld [vmem:[#allocation2] sm:$0xff]  ;;  %v526_v42 = vld [vmem:[#allocation2 + $0x28] sm:$0xff]  ;;  %s1203_s1 = smul.u32 96, %s2340_s5  ;;  %s971_s21 = sshll.u32 %s1927_s29, 4  ;;  %s2213_s21 = int_to_ptr.vmem [resolvable:$true] %s971_s21 }
 0x14c   : > { %v529_v34 = vld [vmem:[#allocation2 + $0x40] sm:$0xff]  ;;  %v524_v35 = vld [vmem:[#allocation2 + $0x18] sm:$0xff]  ;;  %v523_v37 = vld [vmem:[#allocation2 + $0x10] sm:$0xff]  ;;  %s2341_s18 = sld [smem:[#allocation17_spill]]  ;;  %s2342_s0 = sld [smem:[#allocation20_spill]] }
 0x14d   : > { %v532_v36 = vld [vmem:[#allocation2 + $0x58] sm:$0xff]  ;;  %v531_v48 = vld [vmem:[#allocation2 + $0x50] sm:$0xff]  ;;  %v534_v49 = vld [vmem:[#allocation2 + $0x68] sm:$0xff]  ;;  %s968_s26 = sadd.s32 %s1203_s1, %s1147_s22  ;;  %s2221_s10 = scalar_lea.sflag [#allocation5], %s241_s11 }
 0x14e   : > { %736 = vmatpush1.bf16.msra.mxu0 %v1386_v57  ;;  %1190 = vmatpush1.bf16.msra.mxu1 %v1386_v57  ;;  %v525_v43 = vld [vmem:[#allocation2 + $0x20] sm:$0xff]  ;;  %v528_v18 = vld [vmem:[#allocation2 + $0x38] sm:$0xff]  ;;  %v527_v51 = vld [vmem:[#allocation2 + $0x30] sm:$0xff]  ;;  %s1149_s28 = sshll.u32 %s968_s26, 6  ;;  %s1483_s24 = scalar_lea.vmem %s2213_s21, 2048 }
 0x14f   : > { %737 = vmatprep.subr.bf16.mxu0 %v1387_v62  ;;  %1175 = vmatprep.subr.bf16.mxu1 %v1387_v62  ;;  %v533_v14 = vld [vmem:[#allocation2 + $0x60] sm:$0xff]  ;;  %v536_v50 = vld [vmem:[#allocation2 + $0x78] sm:$0xff]  ;;  %v535_v44 = vld [vmem:[#allocation2 + $0x70] sm:$0xff]  ;;  %p1484_p12 = scmp.ne.s32.totalorder %s2213_s21, %s1483_s24  ;;  %s1642_s4 = smov [#allocation8]  }
 0x150   : > { %s1487_s15 = sshll.u32 %s1642_s4, 4  ;;  %s1488_s15 = int_to_ptr.vmem [resolvable:$false] %s1487_s15 }
 0x151   : > { %s1489_s7 = scalar_lea.vmem %s1488_s15, 4096  ;;  %p1490_p10 = scmp.lt.s32.totalorder %s2213_s21, %s1488_s15 }
 0x152   : > { %738 = vmatpush1.bf16.msra.mxu0 %v1389_v28  ;;  %1191 = vmatpush1.bf16.msra.mxu1 %v1389_v28  ;;  %s2211_s9 = scalar_lea.hbm %s2342_s0, %s1149_s28  ;;  %p2343_p9 = scmp.ne.s32.totalorder %s2341_s18, 0 }
 0x153   : > { %739 = vmatprep.subr.bf16.mxu0 %v1390_v29  ;;  %1176 = vmatprep.subr.bf16.mxu1 %v1390_v29  ;;  %p1491_p8 = scmp.lt.s32.totalorder %s1489_s7, %s1483_s24 }
 0x154   : > { %p1485_p0 = pnand %p1484_p12, %p2343_p9 }
 0x155   : > { %p1492_p11 = por %p1491_p8, %p1490_p10 }
 0x156   : > { %740 = vmatpush1.bf16.msra.mxu0 %v1392_v63  ;;  %1192 = vmatpush1.bf16.msra.mxu1 %v1392_v63  ;;  %p1486_p4 = pneg %p1485_p0 }
 0x157   : > { %741 = vmatprep.subr.bf16.mxu0 %v1393_v3  ;;  %1177 = vmatprep.subr.bf16.mxu1 %v1393_v3 }
 0x158   : > { %p1493_p2 = pnand %p1492_p11, %p1486_p4 }
 0x15a   : > { %742 = vmatpush1.bf16.msra.mxu0 %v1395_v31  ;;  %1193 = vmatpush1.bf16.msra.mxu1 %v1395_v31 }
 0x15b   : > { %743 = vmatprep.subr.bf16.mxu0 %v1396_v4  ;;  %1178 = vmatprep.subr.bf16.mxu1 %v1396_v4 }
 0x15e   : > { %744 = vmatpush1.bf16.msra.mxu0 %v1398_v6  ;;  %1194 = vmatpush1.bf16.msra.mxu1 %v1398_v6 }
 0x15f   : > { %745 = vmatprep.subr.bf16.mxu0 %v1399_v7  ;;  %1179 = vmatprep.subr.bf16.mxu1 %v1399_v7 }
 0x162   : > { %746 = vmatpush1.bf16.msra.mxu0 %v1401_v8  ;;  %1195 = vmatpush1.bf16.msra.mxu1 %v1401_v8 }
 0x163   : > { %747 = vmatprep.subr.bf16.mxu0 %v1402_v9  ;;  %1180 = vmatprep.subr.bf16.mxu1 %v1402_v9 }
 0x166   : > { %748 = vmatpush1.bf16.msra.mxu0 %v1404_v17  ;;  %1196 = vmatpush1.bf16.msra.mxu1 %v1404_v17 }
 0x167   : > { %749 = vmatprep.subr.bf16.mxu0 %v1405_v12  ;;  %1181 = vmatprep.subr.bf16.mxu1 %v1405_v12 }
 0x16a   : > { %750 = vmatpush1.bf16.msra.mxu0 %v1407_v21  ;;  %1197 = vmatpush1.bf16.msra.mxu1 %v1407_v21 }
 0x16b   : > { %751 = vmatprep.subr.bf16.mxu0 %v1408_v38  ;;  %1182 = vmatprep.subr.bf16.mxu1 %v1408_v38 }
 0x16e   : > { %752 = vmatpush1.bf16.msra.mxu0 %v1410_v39  ;;  %1198 = vmatpush1.bf16.msra.mxu1 %v1410_v39 }
 0x16f   : > { %753 = vmatprep.subr.bf16.mxu0 %v1411_v13  ;;  %1183 = vmatprep.subr.bf16.mxu1 %v1411_v13 }
 0x172   : > { %754 = vmatpush1.bf16.msra.mxu0 %v1413_v22  ;;  %1199 = vmatpush1.bf16.msra.mxu1 %v1413_v22 }
 0x173   : > { %755 = vmatprep.subr.bf16.mxu0 %v1414_v23  ;;  %1184 = vmatprep.subr.bf16.mxu1 %v1414_v23 }
 0x176   : > { %756 = vmatpush1.bf16.msra.mxu0 %v1416_v40  ;;  %1200 = vmatpush1.bf16.msra.mxu1 %v1416_v40 }
 0x177   : > { %757 = vmatprep.subr.bf16.mxu0 %v1417_v41  ;;  %1185 = vmatprep.subr.bf16.mxu1 %v1417_v41 }
 0x17a   : > { %758 = vmatpush1.bf16.msra.mxu0 %v1419_v26  ;;  %1201 = vmatpush1.bf16.msra.mxu1 %v1419_v26 }
 0x17b   : > { %759 = vmatprep.subr.bf16.mxu0 %v1420_v27  ;;  %1186 = vmatprep.subr.bf16.mxu1 %v1420_v27 }
 0x17e   : > { %760 = vmatpush1.bf16.msra.mxu0 %v1422_v32  ;;  %1202 = vmatpush1.bf16.msra.mxu1 %v1422_v32 }
 0x181   : > { %762 = vmatmul.mubr.bf16.vlgmr.msra.gmra.mrb[0].mxu0 %v521_v33  ;;  %802 = vmatmul.mubr.bf16.vlgmr.msra.gmra.mrb[0].mxu1 %v529_v34 }
 0x182   : > { %771 = vmatprep.mubr.bf16.mxu0 %v524_v35  ;;  %811 = vmatprep.mubr.bf16.mxu1 %v532_v36 }
 0x189   : > { %772 = vmatmul.mubr.bf16.gmra.mrb[4].mxu0 %v523_v37  ;;  %812 = vmatmul.mubr.bf16.gmra.mrb[4].mxu1 %v531_v48 }
 0x18a   : > { %781 = vmatprep.mubr.bf16.mxu0 %v526_v42  ;;  %821 = vmatprep.mubr.bf16.mxu1 %v534_v49 }
 0x191   : > { %782 = vmatmul.mubr.bf16.gmra.mrb[8].mxu0 %v525_v43  ;;  %822 = vmatmul.mubr.bf16.gmra.mrb[8].mxu1 %v533_v14 }
 0x192   : > { %791 = vmatprep.mubr.bf16.mxu0 %v528_v18  ;;  %831 = vmatprep.mubr.bf16.mxu1 %v536_v50 }
 0x199   : > { %792 = vmatmul.mubr.bf16.gmra.mrb[12].mxu0 %v527_v51  ;;  %832 = vmatmul.mubr.bf16.gmra.mrb[12].mxu1 %v535_v44 }
 0x254   : > { %v763_v19 = vpop.f32.mrb[0].mxu0  ;;  %v803_v45 = vpop.f32.mrb[0].mxu1 }
 0x255   : > { %v765_v20 = vpop.f32.mrb[1].mxu0  ;;  %v805_v58 = vpop.f32.mrb[1].mxu1 }
 0x256   : > { %v1155_v59 = vpack.c.bf16 %v765_v20, %v763_v19  ;;  %v1163_v46 = vpack.c.bf16 %v805_v58, %v803_v45  ;;  %v767_v47 = vpop.f32.mrb[2].mxu0  ;;  %v807_v52 = vpop.f32.mrb[2].mxu1 }
 0x257   : > { %v769_v0 = vpop.f32.mrb[3].mxu0  ;;  %v809_v1 = vpop.f32.mrb[3].mxu1 }
 0x258   : > { %938 = vst [vmem:[%s1927_s29] sm:$0xff] %v1155_v59  ;;  %946 = vst [vmem:[%s1927_s29 + $0x40] sm:$0xff] %v1163_v46  ;;  %v1156_v60 = vpack.c.bf16 %v769_v0, %v767_v47  ;;  %v1164_v61 = vpack.c.bf16 %v809_v1, %v807_v52 }
 0x25a   : > { %939 = vst [vmem:[%s1927_s29 + $0x8] sm:$0xff] %v1156_v60  ;;  %947 = vst [vmem:[%s1927_s29 + $0x48] sm:$0xff] %v1164_v61 }
 0x25c   : > { %v773_v53 = vpop.f32.mrb[4].mxu0  ;;  %v813_v2 = vpop.f32.mrb[4].mxu1 }
 0x25d   : > { %v775_v10 = vpop.f32.mrb[5].mxu0  ;;  %v815_v54 = vpop.f32.mrb[5].mxu1 }
 0x25e   : > { %v1157_v11 = vpack.c.bf16 %v775_v10, %v773_v53  ;;  %v1165_v15 = vpack.c.bf16 %v815_v54, %v813_v2  ;;  %v777_v16 = vpop.f32.mrb[6].mxu0  ;;  %v817_v24 = vpop.f32.mrb[6].mxu1 }
 0x25f   : > { %v779_v25 = vpop.f32.mrb[7].mxu0  ;;  %v819_v55 = vpop.f32.mrb[7].mxu1 }
 0x260   : > { %940 = vst [vmem:[%s1927_s29 + $0x10] sm:$0xff] %v1157_v11  ;;  %948 = vst [vmem:[%s1927_s29 + $0x50] sm:$0xff] %v1165_v15  ;;  %v1158_v56 = vpack.c.bf16 %v779_v25, %v777_v16  ;;  %v1166_v57 = vpack.c.bf16 %v819_v55, %v817_v24 }
 0x262   : > { %941 = vst [vmem:[%s1927_s29 + $0x18] sm:$0xff] %v1158_v56  ;;  %949 = vst [vmem:[%s1927_s29 + $0x58] sm:$0xff] %v1166_v57 }
 0x264   : > { %v783_v62 = vpop.f32.mrb[8].mxu0  ;;  %v823_v28 = vpop.f32.mrb[8].mxu1 }
 0x265   : > { %v785_v29 = vpop.f32.mrb[9].mxu0  ;;  %v825_v63 = vpop.f32.mrb[9].mxu1 }
 0x266   : > { %v1159_v3 = vpack.c.bf16 %v785_v29, %v783_v62  ;;  %v1167_v5 = vpack.c.bf16 %v825_v63, %v823_v28  ;;  %v787_v30 = vpop.f32.mrb[10].mxu0  ;;  %v827_v31 = vpop.f32.mrb[10].mxu1 }
 0x267   : > { %v789_v4 = vpop.f32.mrb[11].mxu0  ;;  %v829_v6 = vpop.f32.mrb[11].mxu1 }
 0x268   : > { %942 = vst [vmem:[%s1927_s29 + $0x20] sm:$0xff] %v1159_v3  ;;  %950 = vst [vmem:[%s1927_s29 + $0x60] sm:$0xff] %v1167_v5  ;;  %v1160_v7 = vpack.c.bf16 %v789_v4, %v787_v30  ;;  %v1168_v8 = vpack.c.bf16 %v829_v6, %v827_v31 }
 0x26a   : > { %943 = vst [vmem:[%s1927_s29 + $0x28] sm:$0xff] %v1160_v7  ;;  %951 = vst [vmem:[%s1927_s29 + $0x68] sm:$0xff] %v1168_v8 }
 0x26c   : > { %v793_v9 = vpop.f32.mrb[12].mxu0  ;;  %v833_v17 = vpop.f32.mrb[12].mxu1 }
 0x26d   : > { %v795_v12 = vpop.f32.mrb[13].mxu0  ;;  %v835_v21 = vpop.f32.mrb[13].mxu1 }
 0x26e   : > { %v1161_v38 = vpack.c.bf16 %v795_v12, %v793_v9  ;;  %v1169_v39 = vpack.c.bf16 %v835_v21, %v833_v17  ;;  %v797_v13 = vpop.f32.mrb[14].mxu0  ;;  %v837_v22 = vpop.f32.mrb[14].mxu1 }
 0x26f   : > { %v799_v23 = vpop.f32.mrb[15].mxu0  ;;  %v839_v40 = vpop.f32.mrb[15].mxu1 }
 0x270   : > { %944 = vst [vmem:[%s1927_s29 + $0x30] sm:$0xff] %v1161_v38  ;;  %952 = vst [vmem:[%s1927_s29 + $0x70] sm:$0xff] %v1169_v39  ;;  %v1162_v41 = vpack.c.bf16 %v799_v23, %v797_v13  ;;  %v1170_v26 = vpack.c.bf16 %v839_v40, %v837_v22 }
 0x272   : > { %945 = vst [vmem:[%s1927_s29 + $0x38] sm:$0xff] %v1162_v41  ;;  %953 = vst [vmem:[%s1927_s29 + $0x78] sm:$0xff] %v1170_v26 }
 0x273   : > { %1496 = shalt.err (!%p1493_p2)
}
 0x274   : > { %s1497_s11 = scalar_lea.hbm %s2211_s9, 2048  ;;  %s1501_s1 = scalar_lea.hbm %s2342_s0, 12288 }
 0x275   : > { %p1498_p5 = scmp.ne.s32.totalorder %s2211_s9, %s1497_s11  ;;  %p1502_p13 = scmp.lt.u32.totalorder %s2211_s9, %s2342_s0 }
 0x276   : > { %p1503_p6 = scmp.lt.u32.totalorder %s1501_s1, %s1497_s11  ;;  %p1505_p12 = scmp.lt.u32.totalorder %s1497_s11, %s2211_s9 }
 0x277   : > { %p1499_p3 = pnand %p1498_p5, %p2343_p9 }
 0x278   : > { %p1504_p1 = por %p1503_p6, %p1502_p13 }
 0x279   : > { %p1500_p7 = pneg %p1499_p3 }
 0x27a   : > { %p1506_p0 = por %p1505_p12, %p1504_p1 }
 0x27c   : > { %p1507_p4 = pnand %p1506_p0, %p1500_p7 }
 0x27e   : > { %1510 = shalt.err (!%p1507_p4)
}
 0x27f   : > { %s1643_s28 = smov 128   ;;  %s1644_s27 = smov 384  }
 0x280   : > { %s1645_s8 = smov 8  }
 0x281   : > { %1208 = dma.vmem_to_hbm [thread:$0]  (%p2343_p9), %s2213_s21, 2048, %s2211_s9, %s2221_s10, %s1643_s28, %s1644_s27, %s1645_s8  }
 0x282 PF: > { %p1222_p10 = scmp.ge.s32.totalorder %s1633_s25, 2  ;;  %s986_s24 = sand.u32 1, %s1581_s12  }
 0x283   : > { %p2344_p8 = scmp.ne.s32.totalorder %s2334_s30, 0  ;;  %s987_s4 = scalar_lea.sflag [#allocation5], %s986_s24 }
 0x285   : > { %p1218_p11 = pnand %p1222_p10, %p2344_p8 }
 0x287   : > { %1576 = dma.done.wait (!%p1218_p11), %s987_s4, 2048  }
 0x288   : > { %1578 = vsyncadd (!%p1218_p11), %s987_s4, 4294965248  ;;  %s22_s25 = sadd.s32 1, %s1633_s25   ;;  %s2346_s21 = sld [smem:[#allocation16_spill]] }
 0x289   : > { %p2250_p2 = scmp.ge.s32.totalorder %s22_s25, 8   ;;  %s2347_s22 = sld [smem:[#allocation13_spill]] }
 0x28a   : > { %s2348_s30 = sld [smem:[#allocation14_spill]]  ;;  %s2349_s24 = sld [smem:[#allocation15_spill]] }
 0x28b   : > { %s2351_s12 = smov %s1585_s13  ;;  %s2352_s13 = smov %s1589_s14 }
 0x28c   : > { %s2353_s14 = smov %s1857_s3  ;;  %s2354_s15 = smov %s1597_s16 }
 0x28d   : > { %s2355_s16 = smov %s1601_s17  ;;  %s2357_s18 = smov %s1609_s19 }
 0x28e   : > { %s2356_s17 = smov %s2346_s21  ;;  %s2358_s19 = smov %s1613_s20 }
 0x28f   : > { %s2359_s20 = smov %s1854_s6  ;;  %s2360_s21 = smov %s1625_s23 }
 0x290   : > { %s2361_s23 = smov %s2348_s30  ;;  %21 = sbr.rel (!%p2250_p2) target bundleno = 16 (0x10), region = 94 }
 0x297   :  { %992 = vsyncpa [#allocation4], 1 }
 0x298   :  { %994 = vsyncpa [#allocation4 + $0x1], 1 }
 0x299   :  { %995 = vsyncpa [#allocation7], 1 }
 0x29a   :  { %997 = vsyncpa [#allocation7 + $0x1], 1 }
 0x29b   :  { %998 = vsyncpa [#allocation5], 1 }
 0x29c   :  { %1000 = vsyncpa [#allocation5 + $0x1], 1 }

</bundles_post_ra>
